<compile_context>
chip_gen: v7x
topology: tpu7x:2x2x1
jax: 0.10.0
libtpu: 0.0.40
codegen_flags: <defaults>
</compile_context>

<pallas_src>
import functools
import math

import jax
import jax.numpy as jnp
from jax.experimental import pallas as pl
from jax.experimental.pallas import tpu as pltpu

_LANE = 128   # lane width (VMEM layout padding of last dim)
_SUB = 8      # f32 sublane alignment (second-to-last dim)


# ---------------------------------------------------------------------------
# Kernel
# ---------------------------------------------------------------------------
def _wnmlp_kernel(num_hidden_layers, use_nonlinearity_output, compute_dtype,
                  *refs):
    """refs = x_ref, then (weight, bias) per layer, then out_ref.

    Weight refs are already normalized/scaled and laid out (in, out) so the
    kernel never transposes; bias refs are (1, out) f32.  Feature dims are the
    natural (unpadded) sizes — Mosaic lane-pads the VMEM layout for free.
    """
    x_ref = refs[0]
    out_ref = refs[-1]
    param_refs = refs[1:-1]

    h = x_ref[...].astype(compute_dtype)

    def linear(h, w_ref, b_ref):
        # Contraction over the stored (in, out) layout; f32 MXU accumulation.
        y = jnp.dot(h, w_ref[...], preferred_element_type=jnp.float32)
        return y + b_ref[...]                       # bias (1, out), f32

    # hidden layers: pre-normalized linear + relu
    for i in range(num_hidden_layers):
        w_ref, b_ref = param_refs[2 * i], param_refs[2 * i + 1]
        h = jnp.maximum(linear(h, w_ref, b_ref), 0.0).astype(compute_dtype)

    # output layer
    w_ref, b_ref = param_refs[-2], param_refs[-1]
    out = linear(h, w_ref, b_ref)
    if use_nonlinearity_output:
        out = jnp.maximum(out, 0.0)

    out_ref[...] = out.astype(out_ref.dtype)


# ---------------------------------------------------------------------------
# Helpers
# ---------------------------------------------------------------------------
def _round_up(n, m):
    return pl.cdiv(n, m) * m


def _resident_spec(shape):
    """Constant-index (VMEM-resident) spec; single-buffered when supported."""
    try:
        return pl.BlockSpec(shape, lambda i: (0, 0),
                            pipeline_mode=pl.Buffered(1))
    except TypeError:
        # Older pallas without pipeline_mode: fall back to default buffering.
        return pl.BlockSpec(shape, lambda i: (0, 0))


def _vmem_tile_bytes(shape, itemsize):
    """VMEM footprint of one 2-D tile after Mosaic's (8,128) layout padding."""
    rows = _round_up(shape[-2], _SUB)
    cols = _round_up(shape[-1], _LANE)
    return rows * cols * itemsize


def prepare_wnmlp_params(params, *, num_hidden_layers, use_norm_output,
                         compute_dtype=jnp.bfloat16):
    """One-time parameter prep (hoist out of the per-call path for inference).

    params: list of (direction (out,in), scale (out,), bias (out,)) per layer.
    Returns a list of (weight (in,out) in compute_dtype, bias (1,out) f32):
    weight normalization done once in f32, then scale, transpose, cast.
    Matches PyTorch exactly: d / sqrt(sum(d^2, dim=1)) * scale.
    """
    # TODO(synk): no epsilon on the row norm (PyTorch has none either); an
    # all-zero direction row would produce inf/NaN in both.
    norms = [True] * num_hidden_layers + [use_norm_output]
    prepped = []
    for (d, s, b), nrm in zip(params, norms):
        d32 = d.astype(jnp.float32)
        if nrm:
            d32 = d32 / jnp.sqrt(jnp.sum(d32 * d32, axis=1, keepdims=True))
        w = (s.astype(jnp.float32)[:, None] * d32).T.astype(compute_dtype)
        prepped.append((w, b.astype(jnp.float32)[None, :]))
    return prepped


# ---------------------------------------------------------------------------
# Forward wrapper (single jit)
# ---------------------------------------------------------------------------
def _wnmlp_forward_impl(x, params, *, num_hidden_layers, use_norm_output,
                        use_nonlinearity_output, compute_dtype, out_dtype,
                        block_batch):
    batch, input_dim = x.shape

    # Accept either raw (direction, scale, bias) params or prepared
    # (weight, bias) params from prepare_wnmlp_params().
    if len(params[0]) == 3:
        prepped = prepare_wnmlp_params(
            params, num_hidden_layers=num_hidden_layers,
            use_norm_output=use_norm_output, compute_dtype=compute_dtype)
    else:
        prepped = [(w.astype(compute_dtype), b.astype(jnp.float32))
                   for (w, b) in params]
    weights = [w for w, _ in prepped]
    biases = [b for _, b in prepped]
    out_dim = weights[-1].shape[1]

    # ---- batch tiling: multiple of 8; >= 2 grid steps when batch allows so
    # ("parallel",) spans both TensorCores on v7x. --------------------------
    block_batch = max(_SUB, (block_batch // _SUB) * _SUB)
    tb = max(_SUB, min(block_batch, _round_up(batch, _SUB)))
    if batch > _SUB and pl.cdiv(batch, tb) < 2:
        tb = _round_up(pl.cdiv(batch, 2), _SUB)
    pbatch = _round_up(batch, tb)

    # Only the batch dim is padded (fused with the dtype cast under jit);
    # feature dims stay natural — no HBM-side lane padding.
    x_p = x.astype(compute_dtype)
    if pbatch != batch:
        x_p = jnp.pad(x_p, ((0, pbatch - batch), (0, 0)))

    # ---- specs -------------------------------------------------------------
    # x / out blocks follow the batch grid axis; last block dim == full array
    # dim (exempt from the (8,128) divisibility rule).
    in_specs = [pl.BlockSpec((tb, input_dim), lambda i: (i, 0))]
    flat = []
    for w, b in zip(weights, biases):
        flat += [w, b]
        in_specs.append(_resident_spec(w.shape))   # (in, out), resident
        in_specs.append(_resident_spec(b.shape))   # (1, out), resident
    out_spec = pl.BlockSpec((tb, out_dim), lambda i: (i, 0))

    # ---- explicit scoped-VMEM budget (layout-padded) ------------------------
    comp_bytes = jnp.dtype(compute_dtype).itemsize
    out_bytes = jnp.dtype(out_dtype).itemsize
    need = 0
    for w, b in zip(weights, biases):
        need += _vmem_tile_bytes(w.shape, comp_bytes)          # single-buffered
        need += _vmem_tile_bytes(b.shape, 4)
    need += 2 * _vmem_tile_bytes((tb, input_dim), comp_bytes)  # x double-buffer
    need += 2 * _vmem_tile_bytes((tb, out_dim), out_bytes)     # out double-buffer
    max_feat = max([input_dim, out_dim] + [w.shape[1] for w in weights])
    need += 4 * _vmem_tile_bytes((tb, max_feat), 4)            # live f32 temps
    vmem_limit = int(min(max(need * 5 // 4 + (2 << 20), 32 << 20), 56 << 20))
    # TODO(synk): for hidden dims that blow this budget (esp. v7x's 64 MiB),
    # add a feature-tiled fallback grid axis instead of keeping every weight
    # resident.

    kernel = functools.partial(_wnmlp_kernel, num_hidden_layers,
                               use_nonlinearity_output, compute_dtype)

    out = pl.pallas_call(
        kernel,
        out_shape=jax.ShapeDtypeStruct((pbatch, out_dim), out_dtype),
        grid=(pbatch // tb,),
        in_specs=in_specs,
        out_specs=out_spec,
        compiler_params=pltpu.CompilerParams(
            dimension_semantics=("parallel",),
            vmem_limit_bytes=vmem_limit),
    )(x_p, *flat)

    if pbatch != batch:
        out = out[:batch]
    return out


@functools.partial(jax.jit, static_argnames=(
    "num_hidden_layers", "use_norm_output", "use_nonlinearity_output",
    "compute_dtype", "out_dtype", "block_batch"))
def wnmlp_forward(x, params, *, num_hidden_layers=1, use_norm_output=False,
                  use_nonlinearity_output=False, compute_dtype=jnp.bfloat16,
                  out_dtype=jnp.float32, block_batch=1024):
    """x: (batch, input_dim). params: list of (direction, scale, bias) per
    layer (raw), or list of (weight, bias) from prepare_wnmlp_params()."""
    return _wnmlp_forward_impl(
        x, params, num_hidden_layers=num_hidden_layers,
        use_norm_output=use_norm_output,
        use_nonlinearity_output=use_nonlinearity_output,
        compute_dtype=compute_dtype, out_dtype=out_dtype,
        block_batch=block_batch)


# ---------------------------------------------------------------------------
# Reference / init (test harness)
# ---------------------------------------------------------------------------
def init_wn_linear(key, in_features, out_features):
    """Matches WeightNormalizedLinear.reset_parameters (deterministic w/ key)."""
    stdv = 1.0 / math.sqrt(in_features)
    kd, kb = jax.random.split(key)
    direction = jax.random.uniform(kd, (out_features, in_features),
                                   jnp.float32, -stdv, stdv)
    scale = jnp.ones((out_features,), jnp.float32)       # uniform_(1, 1)
    bias = jax.random.uniform(kb, (out_features,), jnp.float32, -stdv, stdv)
    return direction, scale, bias


def wnmlp_reference(x, params, *, num_hidden_layers=1,
                    use_norm_output=False, use_nonlinearity_output=False):
    """Pure-JAX reference of the PyTorch forward for verification."""
    h = x.astype(jnp.float32)

    def wn_linear(h, d, s, b, norm):
        if norm:
            d = d / jnp.sqrt(jnp.sum(d * d, axis=1, keepdims=True))
        w = s[:, None] * d
        return jnp.dot(h, w.T, precision=jax.lax.Precision.HIGHEST) + b

    for i in range(num_hidden_layers):
        d, s, b = params[i]
        h = jnp.maximum(wn_linear(h, d, s, b, norm=True), 0.0)
    d, s, b = params[num_hidden_layers]
    out = wn_linear(h, d, s, b, norm=use_norm_output)
    if use_nonlinearity_output:
        out = jnp.maximum(out, 0.0)
    return out


def _build_params(key, input_dim, hidden_dim, output_dim, num_hidden_layers):
    keys = jax.random.split(key, num_hidden_layers + 1)
    params = []
    in_f = input_dim
    for i in range(num_hidden_layers):
        params.append(init_wn_linear(keys[i], in_f, hidden_dim))
        in_f = hidden_dim
    params.append(init_wn_linear(
        keys[num_hidden_layers],
        input_dim if num_hidden_layers == 0 else hidden_dim, output_dim))
    return params


if __name__ == "__main__":
    # WNMLP(input_dim=4, hidden_dim=32, output_dim=4, num_hidden_layers=1)
    input_dim, hidden_dim, output_dim = 4, 32, 4
    num_hidden_layers = 1
    use_norm_output = False
    use_nonlinearity_output = False

    key = jax.random.PRNGKey(0)
    kx, kx2, kp = jax.random.split(key, 3)
    params = _build_params(kp, input_dim, hidden_dim, output_dim,
                           num_hidden_layers)

    # --- test 1: small batch, f32 compute -----------------------------------
    batch = 8
    x = jax.random.normal(kx, (batch, input_dim), jnp.float32)
    out = jax.block_until_ready(wnmlp_forward(
        x, params, num_hidden_layers=num_hidden_layers,
        use_norm_output=use_norm_output,
        use_nonlinearity_output=use_nonlinearity_output,
        compute_dtype=jnp.float32))
    ref = wnmlp_reference(x, params, num_hidden_layers=num_hidden_layers,
                          use_norm_output=use_norm_output,
                          use_nonlinearity_output=use_nonlinearity_output)
    assert out.shape == (batch, output_dim)
    assert jnp.allclose(out, ref, atol=2e-3, rtol=2e-3), "f32 mismatch vs ref"

    # --- test 2: ragged batch -> multiple grid tiles, f32 --------------------
    batch2 = 300
    x2 = jax.random.normal(kx2, (batch2, input_dim), jnp.float32)
    out2 = jax.block_until_ready(wnmlp_forward(
        x2, params, num_hidden_layers=num_hidden_layers,
        use_norm_output=use_norm_output,
        use_nonlinearity_output=use_nonlinearity_output,
        compute_dtype=jnp.float32, block_batch=128))
    ref2 = wnmlp_reference(x2, params, num_hidden_layers=num_hidden_layers,
                           use_norm_output=use_norm_output,
                           use_nonlinearity_output=use_nonlinearity_output)
    assert out2.shape == (batch2, output_dim)
    assert jnp.allclose(out2, ref2, atol=2e-3, rtol=2e-3), "tiled mismatch"

    # --- test 3: bf16 (default), prepared params, auto >=2-step grid ---------
    prepped = prepare_wnmlp_params(params, num_hidden_layers=num_hidden_layers,
                                   use_norm_output=use_norm_output,
                                   compute_dtype=jnp.bfloat16)
    out3 = jax.block_until_ready(wnmlp_forward(
        x2, prepped, num_hidden_layers=num_hidden_layers,
        use_norm_output=use_norm_output,
        use_nonlinearity_output=use_nonlinearity_output,
        compute_dtype=jnp.bfloat16))
    assert out3.shape == (batch2, output_dim)
    assert jnp.allclose(out3, ref2, atol=1e-1, rtol=1e-1), "bf16 mismatch"

    print("KERNEL_OK")
</pallas_src>

<mosaic_0001>
module attributes {stable_mosaic.version = 11 : i64} {
  func.func @_wnmlp_kernel(%arg0: i32, %arg1: memref<8x4xf32, #tpu.memory_space<vmem>>, %arg2: memref<4x32xf32, #tpu.memory_space<vmem>>, %arg3: memref<1x32xf32, #tpu.memory_space<vmem>>, %arg4: memref<32x4xf32, #tpu.memory_space<vmem>>, %arg5: memref<1x4xf32, #tpu.memory_space<vmem>>, %arg6: memref<8x4xf32, #tpu.memory_space<vmem>>) attributes {dimension_semantics = [#tpu.dimension_semantics<parallel>], iteration_bounds = array<i64: 1>, scalar_prefetch = 0 : i64, scratch_operands = 0 : i64, tpu.core_type = #tpu.core_type<tc>, window_params = [{transform_indices = @transform_0, window_bounds = array<i64: 8, 4>}, {pipeline_mode = #tpu.pipeline_mode<synchronous>, transform_indices = @transform_1, window_bounds = array<i64: 4, 32>}, {pipeline_mode = #tpu.pipeline_mode<synchronous>, transform_indices = @transform_2, window_bounds = array<i64: 1, 32>}, {pipeline_mode = #tpu.pipeline_mode<synchronous>, transform_indices = @transform_3, window_bounds = array<i64: 32, 4>}, {pipeline_mode = #tpu.pipeline_mode<synchronous>, transform_indices = @transform_4, window_bounds = array<i64: 1, 4>}, {transform_indices = @transform_5, window_bounds = array<i64: 8, 4>}]} {
    %c0 = arith.constant 0 : index
    %c0_0 = arith.constant 0 : index
    %0 = vector.load %arg1[%c0, %c0_0] : memref<8x4xf32, #tpu.memory_space<vmem>>, vector<8x4xf32>
    %c0_1 = arith.constant 0 : index
    %c0_2 = arith.constant 0 : index
    %1 = vector.load %arg2[%c0_1, %c0_2] : memref<4x32xf32, #tpu.memory_space<vmem>>, vector<4x32xf32>
    %cst = arith.constant dense<0.000000e+00> : vector<8x32xf32>
    %2 = tpu.matmul %0, %1, %cst {dimension_numbers = #tpu.dot_dimension_numbers<[1], [0], [0], [1], [0, 0, 1, 1], [], []>} : vector<8x4xf32>, vector<4x32xf32>, vector<8x32xf32> -> vector<8x32xf32>
    %c0_3 = arith.constant 0 : index
    %c0_4 = arith.constant 0 : index
    %3 = vector.load %arg3[%c0_3, %c0_4] : memref<1x32xf32, #tpu.memory_space<vmem>>, vector<1x32xf32>
    %4 = vector.broadcast %3 : vector<1x32xf32> to vector<8x32xf32>
    %5 = arith.addf %2, %4 : vector<8x32xf32>
    %cst_5 = arith.constant 0.000000e+00 : f32
    %6 = vector.broadcast %cst_5 : f32 to vector<8x32xf32>
    %7 = arith.maximumf %5, %6 : vector<8x32xf32>
    %c0_6 = arith.constant 0 : index
    %c0_7 = arith.constant 0 : index
    %8 = vector.load %arg4[%c0_6, %c0_7] : memref<32x4xf32, #tpu.memory_space<vmem>>, vector<32x4xf32>
    %cst_8 = arith.constant dense<0.000000e+00> : vector<8x4xf32>
    %9 = tpu.matmul %7, %8, %cst_8 {dimension_numbers = #tpu.dot_dimension_numbers<[1], [0], [0], [1], [0, 0, 1, 1], [], []>} : vector<8x32xf32>, vector<32x4xf32>, vector<8x4xf32> -> vector<8x4xf32>
    %c0_9 = arith.constant 0 : index
    %c0_10 = arith.constant 0 : index
    %10 = vector.load %arg5[%c0_9, %c0_10] : memref<1x4xf32, #tpu.memory_space<vmem>>, vector<1x4xf32>
    %11 = vector.broadcast %10 : vector<1x4xf32> to vector<8x4xf32>
    %12 = arith.addf %9, %11 : vector<8x4xf32>
    %c0_11 = arith.constant 0 : index
    %c0_12 = arith.constant 0 : index
    %13 = vector.load %arg6[%c0_11, %c0_12] : memref<8x4xf32, #tpu.memory_space<vmem>>, vector<8x4xf32>
    tpu.vector_store %arg6[%c0_11, %c0_12], %12 {strides = array<i32>} : memref<8x4xf32, #tpu.memory_space<vmem>>, vector<8x4xf32>,
    return
  }
  func.func @transform_0(%arg0: i32) -> (i32, i32) {
    %c0_i32 = arith.constant 0 : i32
    %c0_i32_0 = arith.constant 0 : i32
    return %arg0, %c0_i32 : i32, i32
  }
  func.func @transform_1(%arg0: i32) -> (i32, i32) {
    %c0_i32 = arith.constant 0 : i32
    %c0_i32_0 = arith.constant 0 : i32
    %c0_i32_1 = arith.constant 0 : i32
    return %c0_i32, %c0_i32_0 : i32, i32
  }
  func.func @transform_2(%arg0: i32) -> (i32, i32) {
    %c0_i32 = arith.constant 0 : i32
    %c0_i32_0 = arith.constant 0 : i32
    %c0_i32_1 = arith.constant 0 : i32
    return %c0_i32, %c0_i32_0 : i32, i32
  }
  func.func @transform_3(%arg0: i32) -> (i32, i32) {
    %c0_i32 = arith.constant 0 : i32
    %c0_i32_0 = arith.constant 0 : i32
    %c0_i32_1 = arith.constant 0 : i32
    return %c0_i32, %c0_i32_0 : i32, i32
  }
  func.func @transform_4(%arg0: i32) -> (i32, i32) {
    %c0_i32 = arith.constant 0 : i32
    %c0_i32_0 = arith.constant 0 : i32
    %c0_i32_1 = arith.constant 0 : i32
    return %c0_i32, %c0_i32_0 : i32, i32
  }
  func.func @transform_5(%arg0: i32) -> (i32, i32) {
    %c0_i32 = arith.constant 0 : i32
    %c0_i32_0 = arith.constant 0 : i32
    return %arg0, %c0_i32 : i32, i32
  }
}

</mosaic_0001>

<bundles_post_ra>
// kernel: wnmlp_forward.1
= control target key start
LH: loop header
LB: loop body
LE: loop exit
PB: predicated region body
PF: predicated region fallthrough
CT: control target
= control target key end

     0   :  { %vm33_vm0 = vcmask 1043456   ;;  %vm29_vm1 = vcmask 31744   ;;  %v235_v0 = vmov 0.0   ;;  %vm236_vm2 = vmmov 0   ;;  %s297_s1 = inlined_call_operand.vmem [shape: f32[4,32], index: 1, kind: input, shape index: {}]   ;;  %s298_s0 = inlined_call_operand.vmem [shape: f32[8,4], index: 0, kind: input, shape index: {}]   ;;  %s299_s3 = inlined_call_operand.vmem [shape: f32[32,4], index: 3, kind: input, shape index: {}]   ;;  %s300_s2 = inlined_call_operand.vmem [shape: f32[1,32], index: 2, kind: input, shape index: {}]   ;;  %s301_s4 = inlined_call_operand.vmem [shape: f32[1,4], index: 4, kind: input, shape index: {}]   ;;  %s302_s5 = inlined_call_operand.vmem [shape: f32[8,4], index: 5, kind: output, shape index: {}]  }
   0x1   :  { %210 = vmatprep.subr.mxu0 %v235_v0  ;;  %v21_v1 = vld [vmem:[%s297_s1] sm:$0xf]  ;;  %212 = vmatprep.mubr.msk.f32.mxu0 %vm236_vm2, %v235_v0  ;;  %v237_v4 = vmov 0.0|0.0   ;;  %v109_v5 = vld [vmem:[%s299_s3 + $0x8] sm:$0xff]  ;;  %v110_v7 = vld [vmem:[%s299_s3 + $0x10] sm:$0xff]  ;;  %vm119_vm3 = vcmask 261120  }
   0x2   :  { %v20_v2 = vld [vmem:[%s298_s0] sm:$0xff]  ;;  %211 = vmatpush3.msk.msra.mxu0 %vm33_vm0, %v21_v1  ;;  %226 = vmatprep.subr.bf16.mxu1 %v237_v4  ;;  %v111_v8 = vld [vmem:[%s299_s3 + $0x18] sm:$0xff] }
   0x3   :  { %v108_v3 = vld [vmem:[%s299_s3] sm:$0xff]  ;;  %213 = vmatmul.mubr.msk.f32.vlgmr.msra.gmra.mrb[0].mxu0 %vm29_vm1, %v20_v2  ;;  %223 = vmatprep.mubr.msk.f32.mxu1 %vm236_vm2, %v235_v0  ;;  %v230_v9 = vpack.c.bf16 %v111_v8, %v110_v7 }
   0x4   :  { %v227_v6 = vpack.c.bf16 %v109_v5, %v108_v3  ;;  %v198_v10 = vld [vmem:[%s300_s2] ss:$0 sm:$0xff] }
   0x5   :  { %v201_v15 = vld [vmem:[%s301_s4] ss:$0 sm:$0xff] }
   0x6   :  { %228 = vmatpush3.bf16.msra.mxu1 %v227_v6 }
   0x7   :  { %229 = vmatprep.subr.bf16.mxu1 %v237_v4 }
   0xa   :  { %231 = vmatpush3.bf16.msra.mxu1 %v230_v9 }
  0xd6   :  { %v103_v11 = vpop.f32.mrb[0].mxu0 }
  0xd7   :  { %v104_v12 = vadd.f32 %v198_v10, %v103_v11  ;;  %v214_v13 = vpop.f32.mrb[1].mxu0 }
  0xd9   :  { %v107_v14 = vmax.f32 %v104_v12, 0.0 }
  0xdb   :  { %224 = vmatmul.mubr.msk.f32.vlgmr.msra.gmra.mrb[0].mxu1 %vm119_vm3, %v107_v14 }
 0x1ae   :  { %v189_v16 = vpop.f32.mrb[0].mxu1 }
 0x1af   :  { %v190_v17 = vadd.f32 %v201_v15, %v189_v16  ;;  %v225_v18 = vpop.f32.mrb[1].mxu1 }
 0x1b1   :  { %193 = vst.msk [vmem:[%s302_s5] sm:$0xff] %vm29_vm1, %v190_v17 }

</bundles_post_ra>
